<compile_context>
chip_gen: v5e
topology: v5e:2x2
jax: 0.10.0
libtpu: 0.0.40
codegen_flags: <defaults>
</compile_context>

<pallas_src>
import jax
import jax.numpy as jnp
from jax.experimental import pallas as pl
from jax.experimental.pallas import tpu as pltpu


def _attn_kernel(h_ref, enc_ref, wh_ref, we_ref, b_ref, v_ref, mask_ref, out_ref):
    # h_ref   : [tb, dec]  f32         enc_ref : [S, tb, 2E]  (bf16 or f32)
    # wh_ref  : [dec, dec] f32         we_ref  : [2E, dec]    (bf16 or f32)
    # b_ref   : [1, dec]   f32         v_ref   : [1, dec]     f32
    # mask_ref: [S, tb]    int32       out_ref : [S, tb]      f32
    s_len, tb, e2 = enc_ref.shape
    dec = wh_ref.shape[1]

    # Hidden projection with the bias folded in, computed once per batch block: [tb, dec]
    hb = jnp.dot(h_ref[...], wh_ref[...],
                 preferred_element_type=jnp.float32) + b_ref[...]

    # Encoder projection on the MXU (f32 accumulation).
    if tb % 8 == 0:
        # Sublane-aligned batch tile: layout-trivial collapse -> one flat 2-D matmul
        # with M = S*tb (fills the systolic array, single push/pop).
        e_proj = jnp.dot(enc_ref[...].reshape(s_len * tb, e2), we_ref[...],
                         preferred_element_type=jnp.float32).reshape(s_len, tb, dec)
    else:
        # Tiny / unaligned batch tile (e.g. the test shape): keep the 3-D contraction.
        e_proj = jnp.einsum('sbe,ed->sbd', enc_ref[...], we_ref[...],
                            preferred_element_type=jnp.float32)

    energy = jnp.tanh(e_proj + hb[None, :, :])                           # [S, tb, dec]

    # v-projection (Linear(dec, 1, bias=False)) as a lane reduction.
    score = jnp.sum(energy * v_ref[...][None, :, :], axis=-1)            # [S, tb]

    # masked_fill(mask == 0, -1e10), then numerically stable softmax over src_len (axis 0).
    score = jnp.where(mask_ref[...] == 0, jnp.float32(-1.0e10), score)
    m = jnp.max(score, axis=0, keepdims=True)
    e = jnp.exp(score - m)
    denom = jnp.sum(e, axis=0, keepdims=True)
    out_ref[...] = e * pl.reciprocal(denom, approx=True)                 # EUP slot, not VALU


def _pick_tile_b(batch, s_len, e2, dec, enc_bytes, vmem_budget=24 * 1024 * 1024):
    """Largest batch tile (multiple of 8 dividing B) whose working set fits the budget."""
    if batch <= 8:
        return batch
    def need(tb):
        # double-buffered encoder block + f32 energy temp + small score/mask/out blocks
        return 2 * s_len * tb * e2 * enc_bytes + 2 * s_len * tb * dec * 4 + 6 * s_len * tb * 4
    best = None
    for tb in range(8, batch + 1, 8):
        if batch % tb == 0 and need(tb) <= vmem_budget:
            best = tb
    if best is None:
        best = next((tb for tb in range(8, batch + 1, 8) if batch % tb == 0), batch)
    return best


def attention_forward(hidden, encoder_outputs, mask, w_attn, b_attn, v_w,
                      *, use_bf16=True, tile_b=None):
    """hidden:[B,dec], encoder_outputs:[S,B,2*enc], mask:[B,S] -> [B,S] softmax weights."""
    s_len, batch, e2 = encoder_outputs.shape
    dec = hidden.shape[1]
    enc_dtype = jnp.bfloat16 if use_bf16 else jnp.float32
    enc_bytes = jnp.dtype(enc_dtype).itemsize

    # Split the concat-Linear weight; concat order in the reference is (hidden, encoder).
    wh = jnp.transpose(w_attn[:, :dec]).astype(jnp.float32)          # [dec, dec]
    we = jnp.transpose(w_attn[:, dec:]).astype(enc_dtype)            # [2E, dec]
    b2 = b_attn.reshape(1, dec).astype(jnp.float32)                  # [1, dec]
    v2 = v_w.reshape(1, dec).astype(jnp.float32)                     # [1, dec]

    # Native [S, B, 2E] layout: no HBM transpose of the dominant tensor.
    enc = encoder_outputs.astype(enc_dtype)
    mask_t = jnp.transpose(mask.astype(jnp.int32))                   # [S, B] (tiny)
    h = hidden.astype(jnp.float32)

    if tile_b is None:
        tile_b = _pick_tile_b(batch, s_len, e2, dec, enc_bytes)
    grid = (batch // tile_b,)

    # VMEM request: double-buffered encoder blocks + f32 temporaries + resident weights,
    # kept well under v7x's 64 MiB/TC.
    block_bytes = (2 * s_len * tile_b * e2 * enc_bytes
                   + 2 * s_len * tile_b * dec * 4
                   + 6 * s_len * tile_b * 4
                   + (dec * dec + e2 * dec + 2 * dec) * 4
                   + 2 * tile_b * dec * 4)
    vmem_limit = int(min(56 * 1024 * 1024, max(16 * 1024 * 1024, 2 * block_bytes)))

    out_sb = pl.pallas_call(
        _attn_kernel,
        out_shape=jax.ShapeDtypeStruct((s_len, batch), jnp.float32),
        grid_spec=pltpu.PrefetchScalarGridSpec(
            num_scalar_prefetch=0,
            grid=grid,
            in_specs=[
                pl.BlockSpec((tile_b, dec), lambda i: (i, 0)),            # hidden
                pl.BlockSpec((s_len, tile_b, e2), lambda i: (0, i, 0)),   # encoder, native layout
                pl.BlockSpec((dec, dec), lambda i: (0, 0)),               # Wh  (resident)
                pl.BlockSpec((e2, dec), lambda i: (0, 0)),                # We  (resident)
                pl.BlockSpec((1, dec), lambda i: (0, 0)),                 # bias
                pl.BlockSpec((1, dec), lambda i: (0, 0)),                 # v
                pl.BlockSpec((s_len, tile_b), lambda i: (0, i)),          # mask [S, B]
            ],
            out_specs=pl.BlockSpec((s_len, tile_b), lambda i: (0, i)),
        ),
        compiler_params=pltpu.CompilerParams(
            dimension_semantics=("parallel",),       # shard batch across v7x's 2 TCs
            vmem_limit_bytes=vmem_limit,
        ),
    )(h, enc, wh, we, b2, v2, mask_t)

    # Only the tiny [S,B] score is transposed back -- the big encoder tensor never is.
    # TODO(synk): for very large S, pad S to a 128 multiple upstream so output stores are
    # fully lane-dense (padded tail masked to -1e10 before the softmax).
    return jnp.transpose(out_sb)


def _reference(hidden, encoder_outputs, mask, w_attn, b_attn, v_w):
    """Pure-JAX replica of the PyTorch forward for verification."""
    s_len = encoder_outputs.shape[0]
    h_rep = jnp.repeat(hidden[:, None, :], s_len, axis=1)                # [B, S, dec]
    enc_p = jnp.transpose(encoder_outputs, (1, 0, 2))                    # [B, S, 2*enc]
    cat = jnp.concatenate([h_rep, enc_p], axis=2)                        # [B, S, D]
    energy = jnp.tanh(cat @ w_attn.T + b_attn)                           # [B, S, dec]
    attention = (energy @ v_w.reshape(-1, 1))[..., 0]                    # [B, S]
    attention = jnp.where(mask == 0, -1.0e10, attention)
    return jax.nn.softmax(attention, axis=1)


if __name__ == "__main__":
    B, S = 2, 8
    enc_hid, dec_hid = 16, 32
    D = enc_hid * 2 + dec_hid

    key = jax.random.PRNGKey(0)
    k1, k2, k3, k4, k5 = jax.random.split(key, 5)

    # deterministic "Linear" parameters (uniform like nn.Linear default init)
    bound_attn = 1.0 / (D ** 0.5)
    w_attn = jax.random.uniform(k1, (dec_hid, D), jnp.float32, -bound_attn, bound_attn)
    b_attn = jax.random.uniform(k2, (dec_hid,), jnp.float32, -bound_attn, bound_attn)
    bound_v = 1.0 / (dec_hid ** 0.5)
    v_w = jax.random.uniform(k3, (1, dec_hid), jnp.float32, -bound_v, bound_v)

    # inputs
    hidden = jax.random.normal(k4, (B, dec_hid), jnp.float32)
    encoder_outputs = jax.random.normal(k5, (S, B, 2 * enc_hid), jnp.float32)
    lengths = jnp.array([S, S - 3], dtype=jnp.int32)
    mask = (jnp.arange(S)[None, :] < lengths[:, None]).astype(jnp.int32)  # [B, S]

    ref = _reference(hidden, encoder_outputs, mask, w_attn, b_attn, v_w)

    # f32 MXU path (tight check; tolerance only covers the approx EUP reciprocal).
    out_f32 = jax.block_until_ready(
        attention_forward(hidden, encoder_outputs, mask, w_attn, b_attn, v_w, use_bf16=False))
    assert out_f32.shape == (B, S)
    assert jnp.allclose(out_f32, ref, atol=2e-3, rtol=2e-3), "f32 kernel mismatch vs reference"

    # Default bf16 encoder/We path (halves HBM traffic of the dominant tensor; f32 accum).
    out_bf16 = jax.block_until_ready(
        attention_forward(hidden, encoder_outputs, mask, w_attn, b_attn, v_w, use_bf16=True))
    assert out_bf16.shape == (B, S)
    assert jnp.allclose(out_bf16, ref, atol=2e-2, rtol=2e-2), "bf16 kernel mismatch vs reference"

    print("KERNEL_OK")
</pallas_src>

<mosaic_0001>
module attributes {stable_mosaic.version = 11 : i64} {
  func.func @_attn_kernel(%arg0: i32, %arg1: memref<2x32xf32, #tpu.memory_space<vmem>>, %arg2: memref<8x2x32xf32, #tpu.memory_space<vmem>>, %arg3: memref<32x32xf32, #tpu.memory_space<vmem>>, %arg4: memref<32x32xf32, #tpu.memory_space<vmem>>, %arg5: memref<1x32xf32, #tpu.memory_space<vmem>>, %arg6: memref<1x32xf32, #tpu.memory_space<vmem>>, %arg7: memref<8x2xi32, #tpu.memory_space<vmem>>, %arg8: memref<8x2xf32, #tpu.memory_space<vmem>>) attributes {dimension_semantics = [#tpu.dimension_semantics<parallel>], iteration_bounds = array<i64: 1>, scalar_prefetch = 0 : i64, scratch_operands = 0 : i64, tpu.core_type = #tpu.core_type<tc>, window_params = [{transform_indices = @transform_0, window_bounds = array<i64: 2, 32>}, {transform_indices = @transform_1, window_bounds = array<i64: 8, 2, 32>}, {pipeline_mode = #tpu.pipeline_mode<synchronous>, transform_indices = @transform_2, window_bounds = array<i64: 32, 32>}, {pipeline_mode = #tpu.pipeline_mode<synchronous>, transform_indices = @transform_3, window_bounds = array<i64: 32, 32>}, {pipeline_mode = #tpu.pipeline_mode<synchronous>, transform_indices = @transform_4, window_bounds = array<i64: 1, 32>}, {pipeline_mode = #tpu.pipeline_mode<synchronous>, transform_indices = @transform_5, window_bounds = array<i64: 1, 32>}, {transform_indices = @transform_6, window_bounds = array<i64: 8, 2>}, {transform_indices = @transform_7, window_bounds = array<i64: 8, 2>}]} {
    %c0 = arith.constant 0 : index
    %c0_0 = arith.constant 0 : index
    %0 = vector.load %arg1[%c0, %c0_0] : memref<2x32xf32, #tpu.memory_space<vmem>>, vector<2x32xf32>
    %c0_1 = arith.constant 0 : index
    %c0_2 = arith.constant 0 : index
    %1 = vector.load %arg3[%c0_1, %c0_2] : memref<32x32xf32, #tpu.memory_space<vmem>>, vector<32x32xf32>
    %cst = arith.constant dense<0.000000e+00> : vector<2x32xf32>
    %2 = tpu.matmul %0, %1, %cst {dimension_numbers = #tpu.dot_dimension_numbers<[1], [0], [0], [1], [0, 0, 1, 1], [], []>} : vector<2x32xf32>, vector<32x32xf32>, vector<2x32xf32> -> vector<2x32xf32>
    %c0_3 = arith.constant 0 : index
    %c0_4 = arith.constant 0 : index
    %3 = vector.load %arg5[%c0_3, %c0_4] : memref<1x32xf32, #tpu.memory_space<vmem>>, vector<1x32xf32>
    %4 = vector.broadcast %3 : vector<1x32xf32> to vector<2x32xf32>
    %5 = arith.addf %2, %4 : vector<2x32xf32>
    %c0_5 = arith.constant 0 : index
    %c0_6 = arith.constant 0 : index
    %c0_7 = arith.constant 0 : index
    %6 = vector.load %arg2[%c0_5, %c0_6, %c0_7] : memref<8x2x32xf32, #tpu.memory_space<vmem>>, vector<8x2x32xf32>
    %c0_8 = arith.constant 0 : index
    %c0_9 = arith.constant 0 : index
    %7 = vector.load %arg4[%c0_8, %c0_9] : memref<32x32xf32, #tpu.memory_space<vmem>>, vector<32x32xf32>
    "tpu.trace_start"() <{level = 10 : i32, message = "sbe,ed->sbd"}> : () -> ()
    %cst_10 = arith.constant dense<0.000000e+00> : vector<8x2x32xf32>
    %8 = tpu.matmul %6, %7, %cst_10 {dimension_numbers = #tpu.dot_dimension_numbers<[2], [0], [0, 1], [1], [0, 0, 0, 1, 1, 1], [], []>} : vector<8x2x32xf32>, vector<32x32xf32>, vector<8x2x32xf32> -> vector<8x2x32xf32>
    "tpu.trace_stop"() : () -> ()
    %9 = vector.shape_cast %5 : vector<2x32xf32> to vector<1x2x32xf32>
    %10 = vector.broadcast %9 : vector<1x2x32xf32> to vector<8x2x32xf32>
    %11 = arith.addf %8, %10 : vector<8x2x32xf32>
    %12 = math.tanh %11 : vector<8x2x32xf32>
    %c0_11 = arith.constant 0 : index
    %c0_12 = arith.constant 0 : index
    %13 = vector.load %arg6[%c0_11, %c0_12] : memref<1x32xf32, #tpu.memory_space<vmem>>, vector<1x32xf32>
    %14 = vector.shape_cast %13 : vector<1x32xf32> to vector<1x1x32xf32>
    %15 = vector.broadcast %14 : vector<1x1x32xf32> to vector<8x2x32xf32>
    %16 = arith.mulf %12, %15 : vector<8x2x32xf32>
    %cst_13 = arith.constant dense<0.000000e+00> : vector<8x2xf32>
    %17 = vector.multi_reduction <add>, %16, %cst_13 [2] : vector<8x2x32xf32> to vector<8x2xf32>
    %c0_14 = arith.constant 0 : index
    %c0_15 = arith.constant 0 : index
    %18 = vector.load %arg7[%c0_14, %c0_15] : memref<8x2xi32, #tpu.memory_space<vmem>>, vector<8x2xi32>
    %c0_i32 = arith.constant 0 : i32
    %19 = vector.broadcast %c0_i32 : i32 to vector<8x2xi32>
    %20 = arith.cmpi eq, %18, %19 : vector<8x2xi32>
    %cst_16 = arith.constant -1.000000e+10 : f32
    %21 = vector.broadcast %cst_16 : f32 to vector<8x2xf32>
    %22 = arith.select %20, %21, %17 : vector<8x2xi1>, vector<8x2xf32>
    %cst_17 = arith.constant dense<0xFF800000> : vector<2xf32>
    %23 = vector.multi_reduction <maximumf>, %22, %cst_17 [0] : vector<8x2xf32> to vector<2xf32>
    %24 = vector.shape_cast %23 : vector<2xf32> to vector<1x2xf32>
    %25 = vector.broadcast %24 : vector<1x2xf32> to vector<8x2xf32>
    %26 = arith.subf %22, %25 : vector<8x2xf32>
    %27 = math.exp %26 : vector<8x2xf32>
    %cst_18 = arith.constant dense<0.000000e+00> : vector<2xf32>
    %28 = vector.multi_reduction <add>, %27, %cst_18 [0] : vector<8x2xf32> to vector<2xf32>
    %29 = vector.shape_cast %28 : vector<2xf32> to vector<1x2xf32>
    %30 = tpu.reciprocal %29 {approx = true} : vector<1x2xf32> -> vector<1x2xf32>
    %31 = vector.broadcast %30 : vector<1x2xf32> to vector<8x2xf32>
    %32 = arith.mulf %27, %31 : vector<8x2xf32>
    %c0_19 = arith.constant 0 : index
    %c0_20 = arith.constant 0 : index
    %33 = vector.load %arg8[%c0_19, %c0_20] : memref<8x2xf32, #tpu.memory_space<vmem>>, vector<8x2xf32>
    tpu.vector_store %arg8[%c0_19, %c0_20], %32 {strides = array<i32>} : memref<8x2xf32, #tpu.memory_space<vmem>>, vector<8x2xf32>,
    return
  }
  func.func @transform_0(%arg0: i32) -> (i32, i32) {
    %c0_i32 = arith.constant 0 : i32
    %c0_i32_0 = arith.constant 0 : i32
    return %arg0, %c0_i32 : i32, i32
  }
  func.func @transform_1(%arg0: i32) -> (i32, i32, i32) {
    %c0_i32 = arith.constant 0 : i32
    %c0_i32_0 = arith.constant 0 : i32
    %c0_i32_1 = arith.constant 0 : i32
    return %c0_i32, %arg0, %c0_i32_0 : i32, i32, i32
  }
  func.func @transform_2(%arg0: i32) -> (i32, i32) {
    %c0_i32 = arith.constant 0 : i32
    %c0_i32_0 = arith.constant 0 : i32
    %c0_i32_1 = arith.constant 0 : i32
    return %c0_i32, %c0_i32_0 : i32, i32
  }
  func.func @transform_3(%arg0: i32) -> (i32, i32) {
    %c0_i32 = arith.constant 0 : i32
    %c0_i32_0 = arith.constant 0 : i32
    %c0_i32_1 = arith.constant 0 : i32
    return %c0_i32, %c0_i32_0 : i32, i32
  }
  func.func @transform_4(%arg0: i32) -> (i32, i32) {
    %c0_i32 = arith.constant 0 : i32
    %c0_i32_0 = arith.constant 0 : i32
    %c0_i32_1 = arith.constant 0 : i32
    return %c0_i32, %c0_i32_0 : i32, i32
  }
  func.func @transform_5(%arg0: i32) -> (i32, i32) {
    %c0_i32 = arith.constant 0 : i32
    %c0_i32_0 = arith.constant 0 : i32
    %c0_i32_1 = arith.constant 0 : i32
    return %c0_i32, %c0_i32_0 : i32, i32
  }
  func.func @transform_6(%arg0: i32) -> (i32, i32) {
    %c0_i32 = arith.constant 0 : i32
    %c0_i32_0 = arith.constant 0 : i32
    return %c0_i32, %arg0 : i32, i32
  }
  func.func @transform_7(%arg0: i32) -> (i32, i32) {
    %c0_i32 = arith.constant 0 : i32
    %c0_i32_0 = arith.constant 0 : i32
    return %c0_i32, %arg0 : i32, i32
  }
}

</mosaic_0001>

<bundles_post_ra>
// kernel: tpu_custom_call.1
= control target key start
LH: loop header
LB: loop body
LE: loop exit
PB: predicated region body
PF: predicated region fallthrough
CT: control target
= control target key end

     0   :  { %12 = vsyncpa [#allocation3], 0  ;;  %s509_s0 = inlined_call_operand.vmem [shape: f32[2,32], index: 0, kind: input, shape index: {}]   ;;  %s510_s1 = inlined_call_operand.hbm [shape: f32[8,2,32], index: 1, kind: input, shape index: {}]   ;;  %s511_s2 = inlined_call_operand.hbm [shape: f32[32,32], index: 2, kind: input, shape index: {}]   ;;  %s512_s3 = inlined_call_operand.hbm [shape: f32[32,32], index: 3, kind: input, shape index: {}]   ;;  %s513_s4 = inlined_call_operand.vmem [shape: f32[1,32], index: 4, kind: input, shape index: {}]   ;;  %s514_s5 = inlined_call_operand.vmem [shape: f32[1,32], index: 5, kind: input, shape index: {}]   ;;  %s515_s6 = inlined_call_operand.vmem [shape: s32[8,2], index: 6, kind: input, shape index: {}]   ;;  %s516_s7 = inlined_call_operand.vmem [shape: f32[8,2], index: 7, kind: output, shape index: {}]  }
   0x1   :  { %13 = vsyncpa [#allocation5], 0  ;;  %s33_s26 = sshll.u32 %s511_s2, 4  ;;  %s424_s27 = smov [#allocation4]   ;;  %s34_s26 = int_to_ptr.hbm [resolvable:$true] %s33_s26 }
   0x2   :  { %s35_s28 = sshll.u32 %s424_s27, 4  ;;  %s20_s8 = sshll.u32 %s510_s1, 4  ;;  %s36_s28 = int_to_ptr.vmem [resolvable:$true] %s35_s28  ;;  %s21_s8 = int_to_ptr.hbm [resolvable:$true] %s20_s8 }
   0x3   :  { %s425_s9 = smov 128   ;;  %s426_s10 = smov 8  }
   0x4   :  { %41 = dma.hbm_to_vmem [thread:$0]  %s34_s26, 512, %s36_s28, [#allocation5], %s425_s9, %s425_s9, %s426_s10  }
   0x5   :  { %s427_s11 = smov [#allocation2]   ;;  %s428_s13 = smov 32  }
   0x6   :  { %s22_s12 = sshll.u32 %s427_s11, 4  ;;  %s429_s14 = smov 2   ;;  %s23_s12 = int_to_ptr.vmem [resolvable:$true] %s22_s12 }
   0x7   :  { %28 = dma.hbm_to_vmem [thread:$0]  %s21_s8, 256, %s23_s12, [#allocation3], %s428_s13, %s428_s13, %s429_s14  }
   0x8   :  { %s46_s16 = sshll.u32 %s512_s3, 4  ;;  %s430_s17 = smov [#allocation6]   ;;  %s47_s16 = int_to_ptr.hbm [resolvable:$true] %s46_s16 }
   0x9   :  { %s48_s18 = sshll.u32 %s430_s17, 4  ;;  %s49_s18 = int_to_ptr.vmem [resolvable:$true] %s48_s18 }
   0xa   :  { %54 = dma.hbm_to_vmem [thread:$0]  %s47_s16, 512, %s49_s18, [#allocation5], %s425_s9, %s425_s9, %s426_s10  }
   0xb   :  { %420 = dma.done.wait [#allocation3], 256  }
   0xc   :  { %421 = vsyncadd [#allocation3], 4294967040 }
   0xd   :  { %422 = dma.done.wait [#allocation5], 1024  }
   0xe   :  { %423 = vsyncadd [#allocation5], 4294966272  ;;  %v77_v0 = vld [vmem:[#allocation4 + $0x18] sm:$0xff]  ;;  %v76_v1 = vld [vmem:[#allocation4 + $0x10] sm:$0xff]  ;;  %vm82_vm0 = vcmask 261120   ;;  %vm224_vm1 = vcmask 254976   ;;  %v259_v60 = vlaneseq }
   0xf   :  { %98 = vmatpush.msra.mxu0 %v77_v0  ;;  %v117_v2 = vld [vmem:[#allocation6 + $0x18] sm:$0xff]  ;;  %v116_v3 = vld [vmem:[#allocation6 + $0x10] sm:$0xff]  ;;  %v75_v4 = vld [vmem:[#allocation4 + $0x8] sm:$0xff]  ;;  %vm269_vm2 = vcmask 1041409   ;;  %vm271_vm3 = vcmask 1042434   ;;  %vm273_vm4 = vcmask 1043459  }
  0x10   :  { %315 = vmatpush.msra.mxu2 %v117_v2  ;;  %v74_v5 = vld [vmem:[#allocation4] sm:$0xff]  ;;  %v115_v6 = vld [vmem:[#allocation6 + $0x8] sm:$0xff]  ;;  %179 = vmatpush.msra.mxu1 %v117_v2  ;;  %v110_v7 = vld [vmem:[#allocation2 + $0x8] sm:$0x3]  ;;  %v260_v61 = vand.u32 127, %v259_v60  ;;  %vm275_vm5 = vcmask 1044484  }
  0x11   :  { %99 = vmatpush.msra.mxu0 %v76_v1  ;;  %v111_v8 = vld [vmem:[#allocation2 + $0xa] sm:$0x3]  ;;  %v112_v9 = vld [vmem:[#allocation2 + $0xc] sm:$0x3]  ;;  %v73_v10 = vld [vmem:[%s509_s0] sm:$0x3] }
  0x12   :  { %316 = vmatpush.msra.mxu2 %v116_v3  ;;  %v113_v11 = vld [vmem:[#allocation2 + $0xe] sm:$0x3]  ;;  %134 = vst [vmem:[#allocation1 + $0x20] ss:$4 sm:$0xff] %v110_v7  ;;  %180 = vmatpush.msra.mxu1 %v116_v3  ;;  %v114_v12 = vld [vmem:[#allocation6] sm:$0xff]  ;;  %vm277_vm6 = vcmask 1045509  }
  0x13   :  { %100 = vmatpush.msra.mxu0 %v75_v4  ;;  %136 = vst [vmem:[#allocation1 + $0x21] ss:$4 sm:$0xff] %v111_v8  ;;  %v106_v13 = vld [vmem:[#allocation2] sm:$0x3]  ;;  %v107_v14 = vld [vmem:[#allocation2 + $0x2] sm:$0x3] }
  0x14   :  { %317 = vmatpush.msra.mxu2 %v115_v6  ;;  %138 = vst [vmem:[#allocation1 + $0x22] ss:$4 sm:$0xff] %v112_v9  ;;  %181 = vmatpush.msra.mxu1 %v115_v6  ;;  %v108_v15 = vld [vmem:[#allocation2 + $0x4] sm:$0x3]  ;;  %v109_v16 = vld [vmem:[#allocation2 + $0x6] sm:$0x3] }
  0x15   :  { %101 = vmatpush.msra.mxu0 %v74_v5  ;;  %140 = vst [vmem:[#allocation1 + $0x23] ss:$4 sm:$0xff] %v113_v11  ;;  %v326_v19 = vld [vmem:[%s513_s4] ss:$0 sm:$0xff]  ;;  %vm279_vm7 = vcmask 1046534   ;;  %vm281_vm8 = vcmask 1047559  }
  0x16   :  { %312 = vmatmul.msk.f32.vlgmr.msra.gmra.mxu0 %vm82_vm0, %v73_v10  ;;  %318 = vmatpush.msra.mxu2 %v114_v12  ;;  %126 = vst [vmem:[#allocation1] ss:$4 sm:$0xff] %v106_v13  ;;  %v327_v30 = vld [vmem:[%s514_s5] ss:$0 sm:$0xff]  ;;  %vm285_vm10 = vcmask 15360  }
  0x17   :  { %182 = vmatpush.msra.mxu1 %v114_v12  ;;  %128 = vst [vmem:[#allocation1 + $0x1] ss:$4 sm:$0xff] %v107_v14 }
  0x18   :  { %130 = vst [vmem:[#allocation1 + $0x2] ss:$4 sm:$0xff] %v108_v15  ;;  %v249_v15 = vld [vmem:[%s515_s6] sm:$0xff] }
  0x19   :  { %132 = vst [vmem:[#allocation1 + $0x3] ss:$4 sm:$0xff] %v109_v16  ;;  %vm250_vm9 = vcmp.eq.s32.totalorder %v249_v15, 0 }
  0x1c   :  { %v142_v17 = vld.sshfl [vmem:[#allocation1 + $0x20] sm:$0xff pattern:$0x73625140] }
  0x1d   :  { %314 = vmatmul.msk.f32.vlgmr.msra.gmra.mxu2 %vm82_vm0, %v142_v17 }
  0x20   :  { %v141_v18 = vld.sshfl [vmem:[#allocation1] sm:$0xff pattern:$0x73625140] }
  0x21   :  { %313 = vmatmul.msk.f32.vlgmr.msra.gmra.mxu1 %vm82_vm0, %v141_v18 }
  0x93   :  { %v103_v20 = vpop.f32.mrf.mxu0 }
  0x94   :  { %v104_v21 = vadd.f32 %v326_v19, %v103_v20 }
  0x96   :  { %144 = vst [vmem:[#allocation1] ss:$4 sm:$0xff] %v104_v21 }
  0x97   :  { %146 = vst [vmem:[#allocation1 + $0x1] ss:$4 sm:$0xff] %v104_v21 }
  0x98   :  { %148 = vst [vmem:[#allocation1 + $0x2] ss:$4 sm:$0xff] %v104_v21 }
  0x99   :  { %150 = vst [vmem:[#allocation1 + $0x3] ss:$4 sm:$0xff] %v104_v21 }
  0x9a   :  { %152 = vst [vmem:[#allocation1 + $0x20] ss:$4 sm:$0xff] %v104_v21 }
  0x9b   :  { %154 = vst [vmem:[#allocation1 + $0x21] ss:$4 sm:$0xff] %v104_v21 }
  0x9c   :  { %156 = vst [vmem:[#allocation1 + $0x22] ss:$4 sm:$0xff] %v104_v21 }
  0x9d   :  { %158 = vst [vmem:[#allocation1 + $0x23] ss:$4 sm:$0xff] %v104_v21 }
  0x9e   :  { %v184_v22 = vpop.f32.mrf.mxu1 }
  0xa0   :  { %v159_v23 = vld.sshfl [vmem:[#allocation1] sm:$0xff pattern:$0x73625140]  ;;  %v187_v25 = vpop.f32.mrf.mxu2 }
  0xa1   :  { %v185_v24 = vadd.f32 %v184_v22, %v159_v23 }
  0xa3   :  { %v192_v26 = vrot.slane %v185_v24, 2  ;;  %328 = vtanh.f32 %v185_v24  ;;  %v193_v27 = vrot.slane %v185_v24, 4  ;;  %v194_v32 = vrot.slane %v185_v24, 6 }
  0xa4   :  { %v160_v28 = vld.sshfl [vmem:[#allocation1 + $0x20] sm:$0xff pattern:$0x73625140] }
  0xa5   :  { %v188_v29 = vadd.f32 %v187_v25, %v160_v28  ;;  %330 = vtanh.f32 %v192_v26 }
  0xa7   :  { %v195_v31 = vrot.slane %v188_v29, 2  ;;  %332 = vtanh.f32 %v188_v29  ;;  %v196_v35 = vrot.slane %v188_v29, 4  ;;  %v197_v42 = vrot.slane %v188_v29, 6 }
  0xa8   :  { %334 = vtanh.f32 %v193_v27 }
  0xa9   :  { %v329_v33 = vpop.eup %328  ;;  %336 = vtanh.f32 %v195_v31 }
  0xaa   :  { %v216_v34 = vmul.f32 %v329_v33, %v327_v30  ;;  %338 = vtanh.f32 %v194_v32 }
  0xab   :  { %v331_v36 = vpop.eup %330  ;;  %340 = vtanh.f32 %v196_v35 }
  0xac   :  { %v225_v37 = vsel %vm224_vm1, %v216_v34, 0.0  ;;  %v217_v44 = vmul.f32 %v331_v36, %v327_v30  ;;  %342 = vtanh.f32 %v197_v42 }
  0xad   :  { %v333_v38 = vpop.eup %332  ;;  %226 = vadd.xlane.f32.xlu0 %v225_v37 }
  0xae   :  { %v335_v39 = vpop.eup %334  ;;  %v220_v40 = vmul.f32 %v333_v38, %v327_v30  ;;  %v228_v49 = vsel %vm224_vm1, %v217_v44, 0.0 }
  0xaf   :  { %v218_v41 = vmul.f32 %v335_v39, %v327_v30  ;;  %v337_v45 = vpop.eup %336 }
  0xb0   :  { %v237_v43 = vsel %vm224_vm1, %v220_v40, 0.0  ;;  %v339_v47 = vpop.eup %338  ;;  %v221_v48 = vmul.f32 %v337_v45, %v327_v30 }
  0xb1   :  { %238 = vadd.xlane.f32.xlu2 %v237_v43  ;;  %v231_v46 = vsel %vm224_vm1, %v218_v41, 0.0  ;;  %v341_v50 = vpop.eup %340  ;;  %v219_v51 = vmul.f32 %v339_v47, %v327_v30 }
  0xb2   :  { %232 = vadd.xlane.f32.xlu1 %v231_v46  ;;  %v240_v52 = vsel %vm224_vm1, %v221_v48, 0.0  ;;  %v222_v53 = vmul.f32 %v341_v50, %v327_v30  ;;  %v343_v55 = vpop.eup %342 }
  0xb3   :  { %v234_v54 = vsel %vm224_vm1, %v219_v51, 0.0  ;;  %v223_v57 = vmul.f32 %v343_v55, %v327_v30 }
  0xb4   :  { %v243_v56 = vsel %vm224_vm1, %v222_v53, 0.0 }
  0xb5   :  { %229 = vadd.xlane.f32.xlu0 %v228_v49  ;;  %v246_v58 = vsel %vm224_vm1, %v223_v57, 0.0 }
  0xb9   :  { %241 = vadd.xlane.f32.xlu2 %v240_v52 }
  0xba   :  { %235 = vadd.xlane.f32.xlu1 %v234_v54 }
  0xbd   :  { %244 = vadd.xlane.f32.xlu0 %v243_v56 }
  0xc2   :  { %247 = vadd.xlane.f32.xlu1 %v246_v58 }
 0x120   :  { %v227_v59 = vpop.xlane.xlu0 %226 }
 0x121   :  { %v261_v1 = vperm.slane %v227_v59, %v260_v61 }
 0x124   :  { %v239_v62 = vpop.xlane.xlu2 %238 }
 0x125   :  { %v233_v63 = vpop.xlane.xlu1 %232  ;;  %v265_v8 = vperm.slane %v239_v62, %v260_v61 }
 0x126   :  { %v263_v3 = vperm.slane %v233_v63, %v260_v61 }
 0x128   :  { %v230_v0 = vpop.xlane.xlu0 %229 }
 0x129   :  { %v262_v2 = vperm.slane %v230_v0, %v260_v61 }
 0x12b   :  { %v270_v4 = vsel %vm269_vm2, %v262_v2, %v261_v1 }
 0x12c   :  { %v272_v6 = vsel %vm271_vm3, %v263_v3, %v270_v4  ;;  %v242_v9 = vpop.xlane.xlu2 %241 }
 0x12d   :  { %v236_v5 = vpop.xlane.xlu1 %235  ;;  %v266_v14 = vperm.slane %v242_v9, %v260_v61 }
 0x12e   :  { %v264_v7 = vperm.slane %v236_v5, %v260_v61 }
 0x130   :  { %v274_v10 = vsel %vm273_vm4, %v264_v7, %v272_v6  ;;  %v245_v11 = vpop.xlane.xlu0 %244 }
 0x131   :  { %v276_v12 = vsel %vm275_vm5, %v265_v8, %v274_v10  ;;  %v267_v13 = vperm.slane %v245_v11, %v260_v61 }
 0x132   :  { %v278_v16 = vsel %vm277_vm6, %v266_v14, %v276_v12 }
 0x133   :  { %v280_v17 = vsel %vm279_vm7, %v267_v13, %v278_v16 }
 0x135   :  { %v248_v18 = vpop.xlane.xlu1 %247 }
 0x136   :  { %v268_v19 = vperm.slane %v248_v18, %v260_v61 }
 0x138   :  { %v282_v20 = vsel %vm281_vm8, %v268_v19, %v280_v17 }
 0x139   :  { %v284_v21 = vsel %vm250_vm9, -1e+10, %v282_v20 }
 0x13a   :  { %v286_v22 = vsel %vm285_vm10, %v284_v21, -inf }
 0x13b   :  { %v287_v23 = vrot.slane %v286_v22, 4 }
 0x13d   :  { %v288_v24 = vmax.f32 %v286_v22, %v287_v23 }
 0x13f   :  { %v289_v25 = vrot.slane %v288_v24, 2 }
 0x141   :  { %v290_v26 = vmax.f32 %v288_v24, %v289_v25 }
 0x143   :  { %v291_v27 = vrot.slane %v290_v26, 1 }
 0x145   :  { %v292_v28 = vmax.f32 %v290_v26, %v291_v27 }
 0x147   :  { %v293_v29 = vsub.f32 %v284_v21, %v292_v28 }
 0x149   :  { %v294_v30 = vmul.f32 1.442695, %v293_v29 }
 0x14b   :  { %344 = vpow2.f32 %v294_v30 }
 0x151   :  { %v345_v31 = vpop.eup %344 }
 0x152   :  { %v296_v32 = vsel %vm285_vm10, %v345_v31, 0.0 }
 0x153   :  { %v297_v33 = vrot.slane %v296_v32, 4 }
 0x155   :  { %v298_v34 = vadd.f32 %v297_v33, %v296_v32 }
 0x157   :  { %v299_v35 = vrot.slane %v298_v34, 2 }
 0x159   :  { %v300_v36 = vadd.f32 %v299_v35, %v298_v34 }
 0x15b   :  { %v301_v37 = vrot.slane %v300_v36, 1 }
 0x15d   :  { %v302_v38 = vadd.f32 %v301_v37, %v300_v36 }
 0x15f   :  { %346 = vrcp.f32 %v302_v38 }
 0x165   :  { %v347_v39 = vpop.eup %346 }
 0x166   :  { %v304_v40 = vmul.f32 %v347_v39, %v345_v31 }
 0x168   :  { %305 = vst.msk [vmem:[%s516_s7] sm:$0xff] %vm285_vm10, %v304_v40 }
 0x169   :  { %310 = vsyncpa [#allocation3], 1 }
 0x16a   :  { %311 = vsyncpa [#allocation5], 1 }

</bundles_post_ra>
